<compile_context>
chip_gen: v5e
topology: v5e:2x2
jax: 0.10.0
libtpu: 0.0.40
codegen_flags: <defaults>
</compile_context>

<pallas_src>
import jax
import jax.numpy as jnp
from jax.experimental import pallas as pl
from jax.experimental.pallas import tpu as pltpu

H1_PAD = 512     # 400 padded to a lane multiple of 128
H2_PAD = 384     # 300 padded to a lane multiple of 128
OUT_LANES = 128  # lane-dense output width; wrapper slices [:, :1]
TAIL_ROWS = 8    # f32 tail buffer rows: b1, b2, w3-row, b3, zero padding


def actor_ddpg_kernel(x_ref, w1_ref, w2_ref, tail_ref, o_ref):
    B = x_ref.shape[0]

    # Fused input cast (VPU, free): raw f32 state -> bf16 MXU operand.
    x = x_ref[...].astype(jnp.bfloat16)                      # (B, S)

    # f32 tail: row 0 = b1, row 1 = b2, row 2 = w3 (as a row), row 3 = b3 scalar.
    b1 = tail_ref[0:1, :]                                    # (1, 512) f32
    b2 = tail_ref[1:2, 0:H2_PAD]                             # (1, 384) f32
    w3 = tail_ref[2:3, 0:H2_PAD]                             # (1, 384) f32
    b3 = tail_ref[3:4, 0:1]                                  # (1, 1)   f32

    # Layer 1: Linear(state_space, 400) + ReLU   (bf16 MXU, f32 accumulation)
    h1 = jnp.dot(x, w1_ref[...], preferred_element_type=jnp.float32) + b1
    h1 = jnp.maximum(h1, 0.0)                                # (B, 512); cols 400+ are 0

    # Layer 2: Linear(400, 300) + ReLU
    h2 = jnp.dot(h1.astype(jnp.bfloat16), w2_ref[...],
                 preferred_element_type=jnp.float32) + b2
    h2 = jnp.maximum(h2, 0.0)                                # (B, 384); cols 300+ are 0

    # Layer 3: Linear(300, 1) + Tanh as a VPU multiply + XLU lane reduction
    # (a lane-1 MXU operand would be wasteful; padded lanes are exactly zero).
    y = jnp.tanh(jnp.sum(h2 * w3, axis=-1, keepdims=True) + b3)   # (B, 1) f32

    # Lane-dense store: broadcast across 128 lanes -> unmasked vst, no sub-tile DMA.
    o_ref[...] = jnp.broadcast_to(y, (B, OUT_LANES))


def pack_params(params, state_space):
    """One-time packing (done once per parameter update, not per call).

    Returns:
      w1p:  (state_space, 512) bf16 -- w1, columns zero-padded 400 -> 512.
      w2p:  (512, 384) bf16         -- w2, zero-padded on both dims.
      tail: (8, 512) f32            -- rows: b1 / b2 / w3-as-row / b3-scalar / zeros.
    """
    w1p = jnp.zeros((state_space, H1_PAD), jnp.float32)
    w1p = w1p.at[:, :400].set(params["w1"]).astype(jnp.bfloat16)

    w2p = jnp.zeros((H1_PAD, H2_PAD), jnp.float32)
    w2p = w2p.at[:400, :300].set(params["w2"]).astype(jnp.bfloat16)

    tail = jnp.zeros((TAIL_ROWS, H1_PAD), jnp.float32)
    tail = tail.at[0, :400].set(params["b1"][0])
    tail = tail.at[1, :300].set(params["b2"][0])
    tail = tail.at[2, :300].set(params["w3"][:, 0])
    tail = tail.at[3, 0].set(params["b3"][0, 0])
    return w1p, w2p, tail


@jax.jit
def actor_ddpg_forward(x, w1p, w2p, tail):
    """x: (B, state_space) f32 (raw, unpadded).  w1p/w2p/tail: pack_params() outputs."""
    B, S = x.shape
    out = pl.pallas_call(
        actor_ddpg_kernel,
        out_shape=jax.ShapeDtypeStruct((B, OUT_LANES), jnp.float32),
        grid=(1,),
        in_specs=[
            pl.BlockSpec((B, S), lambda i: (0, 0)),            # full-array block: legal
            pl.BlockSpec((S, H1_PAD), lambda i: (0, 0)),
            pl.BlockSpec((H1_PAD, H2_PAD), lambda i: (0, 0)),
            pl.BlockSpec((TAIL_ROWS, H1_PAD), lambda i: (0, 0)),
        ],
        out_specs=pl.BlockSpec((B, OUT_LANES), lambda i: (0, 0)),
        compiler_params=pltpu.CompilerParams(
            dimension_semantics=("arbitrary",)),
    )(x, w1p, w2p, tail)
    return out[:, :1]


def init_params(key, state_space):
    """Deterministic init mirroring PyTorch defaults:
       Linear layers 1 & 2: U(-1/sqrt(fan_in), 1/sqrt(fan_in)) for W and b.
       Last layer: U(-3e-3, 3e-3) for W and b (as in Actor_DDPG.__init__)."""
    dims = [(state_space, 400), (400, 300), (300, 1)]
    keys = jax.random.split(key, 6)
    params = {}
    for idx, (fan_in, fan_out) in enumerate(dims, start=1):
        bound = 1.0 / jnp.sqrt(float(fan_in)) if idx < 3 else 3.0 * 0.001
        # stored as (in, out) -> used directly as x @ W
        params[f"w{idx}"] = jax.random.uniform(
            keys[2 * (idx - 1)], (fan_in, fan_out),
            minval=-bound, maxval=bound, dtype=jnp.float32)
        params[f"b{idx}"] = jax.random.uniform(
            keys[2 * (idx - 1) + 1], (1, fan_out),
            minval=-bound, maxval=bound, dtype=jnp.float32)
    return params


def reference_forward(x, params):
    h1 = jnp.maximum(x @ params["w1"] + params["b1"], 0.0)
    h2 = jnp.maximum(h1 @ params["w2"] + params["b2"], 0.0)
    return jnp.tanh(h2 @ params["w3"] + params["b3"])


if __name__ == "__main__":
    # TODO(synk): batch=True variant (BatchNorm1d branches) not implemented;
    # this script implements the batch=False branch of Actor_DDPG.
    key = jax.random.PRNGKey(0)
    state_space = 32
    batch = 8

    pkey, xkey = jax.random.split(key)
    params = init_params(pkey, state_space)
    x = jax.random.normal(xkey, (batch, state_space), dtype=jnp.float32)

    w1p, w2p, tail = pack_params(params, state_space)
    out = actor_ddpg_forward(x, w1p, w2p, tail)
    out = jax.block_until_ready(out)

    ref = reference_forward(x, params)
    assert out.shape == (batch, 1)
    # bf16 activations/weights (f32 biases + last layer) -> loosened tolerance
    # vs. the pure-f32 reference.
    assert jnp.allclose(out, ref, atol=5e-3, rtol=5e-2), "mismatch vs JAX reference"

    print("KERNEL_OK")
</pallas_src>

<mosaic_0001>
module attributes {stable_mosaic.version = 11 : i64} {
  func.func @actor_ddpg_kernel(%arg0: i32, %arg1: memref<8x32xf32, #tpu.memory_space<vmem>>, %arg2: memref<32x512xbf16, #tpu.memory_space<vmem>>, %arg3: memref<512x384xbf16, #tpu.memory_space<vmem>>, %arg4: memref<8x512xf32, #tpu.memory_space<vmem>>, %arg5: memref<8x128xf32, #tpu.memory_space<vmem>>) attributes {dimension_semantics = [#tpu.dimension_semantics<arbitrary>], iteration_bounds = array<i64: 1>, scalar_prefetch = 0 : i64, scratch_operands = 0 : i64, tpu.core_type = #tpu.core_type<tc>, window_params = [{pipeline_mode = #tpu.pipeline_mode<synchronous>, transform_indices = @transform_0, window_bounds = array<i64: 8, 32>}, {pipeline_mode = #tpu.pipeline_mode<synchronous>, transform_indices = @transform_1, window_bounds = array<i64: 32, 512>}, {pipeline_mode = #tpu.pipeline_mode<synchronous>, transform_indices = @transform_2, window_bounds = array<i64: 512, 384>}, {pipeline_mode = #tpu.pipeline_mode<synchronous>, transform_indices = @transform_3, window_bounds = array<i64: 8, 512>}, {pipeline_mode = #tpu.pipeline_mode<synchronous>, transform_indices = @transform_4, window_bounds = array<i64: 8, 128>}]} {
    %c0 = arith.constant 0 : index
    %c0_0 = arith.constant 0 : index
    %0 = vector.load %arg1[%c0, %c0_0] : memref<8x32xf32, #tpu.memory_space<vmem>>, vector<8x32xf32>
    %1 = arith.truncf %0 : vector<8x32xf32> to vector<8x32xbf16>
    %c0_1 = arith.constant 0 : index
    %c0_2 = arith.constant 0 : index
    %2 = vector.load %arg4[%c0_1, %c0_2] : memref<8x512xf32, #tpu.memory_space<vmem>>, vector<1x512xf32>
    %c1 = arith.constant 1 : index
    %c0_3 = arith.constant 0 : index
    %3 = vector.load %arg4[%c1, %c0_3] : memref<8x512xf32, #tpu.memory_space<vmem>>, vector<1x384xf32>
    %c2 = arith.constant 2 : index
    %c0_4 = arith.constant 0 : index
    %4 = vector.load %arg4[%c2, %c0_4] : memref<8x512xf32, #tpu.memory_space<vmem>>, vector<1x384xf32>
    %c3 = arith.constant 3 : index
    %c0_5 = arith.constant 0 : index
    %5 = vector.load %arg4[%c3, %c0_5] : memref<8x512xf32, #tpu.memory_space<vmem>>, vector<1x1xf32>
    %c0_6 = arith.constant 0 : index
    %c0_7 = arith.constant 0 : index
    %6 = vector.load %arg2[%c0_6, %c0_7] : memref<32x512xbf16, #tpu.memory_space<vmem>>, vector<32x512xbf16>
    %cst = arith.constant dense<0.000000e+00> : vector<8x512xf32>
    %7 = tpu.matmul %1, %6, %cst {dimension_numbers = #tpu.dot_dimension_numbers<[1], [0], [0], [1], [0, 0, 1, 1], [], []>} : vector<8x32xbf16>, vector<32x512xbf16>, vector<8x512xf32> -> vector<8x512xf32>
    %8 = vector.broadcast %2 : vector<1x512xf32> to vector<8x512xf32>
    %9 = arith.addf %7, %8 : vector<8x512xf32>
    %cst_8 = arith.constant 0.000000e+00 : f32
    %10 = vector.broadcast %cst_8 : f32 to vector<8x512xf32>
    %11 = arith.maximumf %9, %10 : vector<8x512xf32>
    %12 = arith.truncf %11 : vector<8x512xf32> to vector<8x512xbf16>
    %c0_9 = arith.constant 0 : index
    %c0_10 = arith.constant 0 : index
    %13 = vector.load %arg3[%c0_9, %c0_10] : memref<512x384xbf16, #tpu.memory_space<vmem>>, vector<512x384xbf16>
    %cst_11 = arith.constant dense<0.000000e+00> : vector<8x384xf32>
    %14 = tpu.matmul %12, %13, %cst_11 {dimension_numbers = #tpu.dot_dimension_numbers<[1], [0], [0], [1], [0, 0, 1, 1], [], []>} : vector<8x512xbf16>, vector<512x384xbf16>, vector<8x384xf32> -> vector<8x384xf32>
    %15 = vector.broadcast %3 : vector<1x384xf32> to vector<8x384xf32>
    %16 = arith.addf %14, %15 : vector<8x384xf32>
    %cst_12 = arith.constant 0.000000e+00 : f32
    %17 = vector.broadcast %cst_12 : f32 to vector<8x384xf32>
    %18 = arith.maximumf %16, %17 : vector<8x384xf32>
    %19 = vector.broadcast %4 : vector<1x384xf32> to vector<8x384xf32>
    %20 = arith.mulf %18, %19 : vector<8x384xf32>
    %cst_13 = arith.constant dense<0.000000e+00> : vector<8xf32>
    %21 = vector.multi_reduction <add>, %20, %cst_13 [1] : vector<8x384xf32> to vector<8xf32>
    %22 = vector.shape_cast %21 : vector<8xf32> to vector<8x1xf32>
    %23 = vector.broadcast %5 : vector<1x1xf32> to vector<8x1xf32>
    %24 = arith.addf %22, %23 : vector<8x1xf32>
    %25 = math.tanh %24 : vector<8x1xf32>
    %26 = vector.shape_cast %25 : vector<8x1xf32> to vector<8x1xf32>
    %27 = vector.broadcast %26 : vector<8x1xf32> to vector<8x128xf32>
    %c0_14 = arith.constant 0 : index
    %c0_15 = arith.constant 0 : index
    %28 = vector.load %arg5[%c0_14, %c0_15] : memref<8x128xf32, #tpu.memory_space<vmem>>, vector<8x128xf32>
    tpu.vector_store %arg5[%c0_14, %c0_15], %27 {strides = array<i32>} : memref<8x128xf32, #tpu.memory_space<vmem>>, vector<8x128xf32>,
    return
  }
  func.func @transform_0(%arg0: i32) -> (i32, i32) {
    %c0_i32 = arith.constant 0 : i32
    %c0_i32_0 = arith.constant 0 : i32
    %c0_i32_1 = arith.constant 0 : i32
    return %c0_i32, %c0_i32_0 : i32, i32
  }
  func.func @transform_1(%arg0: i32) -> (i32, i32) {
    %c0_i32 = arith.constant 0 : i32
    %c0_i32_0 = arith.constant 0 : i32
    %c0_i32_1 = arith.constant 0 : i32
    return %c0_i32, %c0_i32_0 : i32, i32
  }
  func.func @transform_2(%arg0: i32) -> (i32, i32) {
    %c0_i32 = arith.constant 0 : i32
    %c0_i32_0 = arith.constant 0 : i32
    %c0_i32_1 = arith.constant 0 : i32
    return %c0_i32, %c0_i32_0 : i32, i32
  }
  func.func @transform_3(%arg0: i32) -> (i32, i32) {
    %c0_i32 = arith.constant 0 : i32
    %c0_i32_0 = arith.constant 0 : i32
    %c0_i32_1 = arith.constant 0 : i32
    return %c0_i32, %c0_i32_0 : i32, i32
  }
  func.func @transform_4(%arg0: i32) -> (i32, i32) {
    %c0_i32 = arith.constant 0 : i32
    %c0_i32_0 = arith.constant 0 : i32
    %c0_i32_1 = arith.constant 0 : i32
    return %c0_i32, %c0_i32_0 : i32, i32
  }
}

</mosaic_0001>

<bundles_post_ra>
// kernel: actor_ddpg_forward.1
= control target key start
LH: loop header
LB: loop body
LE: loop exit
PB: predicated region body
PF: predicated region fallthrough
CT: control target
= control target key end

     0   :  { %9 = vsyncpa [#allocation3], 0  ;;  %s1752_s0 = inlined_call_operand.hbm [shape: f32[8,32], index: 0, kind: input, shape index: {}]   ;;  %s1753_s1 = inlined_call_operand.hbm [shape: bf16[32,512], index: 1, kind: input, shape index: {}]   ;;  %s1754_s2 = inlined_call_operand.hbm [shape: bf16[512,384], index: 2, kind: input, shape index: {}]   ;;  %s1755_s3 = inlined_call_operand.hbm [shape: f32[8,512], index: 3, kind: input, shape index: {}]   ;;  %s1756_s4 = inlined_call_operand.vmem [shape: f32[8,128], index: 4, kind: output, shape index: {}]  }
   0x1   :  { %10 = vsyncpa [#allocation5], 0  ;;  %s27_s17 = sshll.u32 %s1753_s1, 4  ;;  %s28_s17 = int_to_ptr.hbm [resolvable:$true] %s27_s17 }
   0x2   :  { %11 = vsyncpa [#allocation8], 0  ;;  %s1679_s18 = smov [#allocation4]   ;;  %s17_s22 = sshll.u32 %s1752_s0, 4  ;;  %s18_s22 = int_to_ptr.hbm [resolvable:$true] %s17_s22 }
   0x3   :  { %s29_s19 = sshll.u32 %s1679_s18, 4  ;;  %s1680_s23 = smov 256   ;;  %s30_s19 = int_to_ptr.vmem [resolvable:$true] %s29_s19 }
   0x4   :  { %s1681_s24 = smov 16   ;;  %s1682_s25 = smov [#allocation2]  }
   0x5   :  { %35 = dma.hbm_to_vmem [thread:$0]  %s28_s17, 1024, %s30_s19, [#allocation5], %s1680_s23, %s1680_s23, %s1681_s24  }
   0x6   :  { %s19_s26 = sshll.u32 %s1682_s25, 4  ;;  %s40_s29 = sshll.u32 %s1754_s2, 4  ;;  %s20_s26 = int_to_ptr.vmem [resolvable:$true] %s19_s26  ;;  %s41_s29 = int_to_ptr.hbm [resolvable:$true] %s40_s29 }
   0x7   :  { %22 = dma.hbm_to_vmem [thread:$0]  %s18_s22, 128, %s20_s26, [#allocation3]  }
   0x8   :  { %s1683_s1 = smov [#allocation6]   ;;  %s54_s0 = sshll.u32 %s1755_s3, 4  ;;  %s55_s0 = int_to_ptr.hbm [resolvable:$true] %s54_s0 }
   0x9   :  { %s42_s30 = sshll.u32 %s1683_s1, 4  ;;  %s1684_s7 = smov 192   ;;  %s43_s30 = int_to_ptr.vmem [resolvable:$true] %s42_s30 }
   0xa   :  { %s1685_s8 = smov 12   ;;  %s1686_s9 = smov [#allocation7]  }
   0xb   :  { %48 = dma.hbm_to_vmem [thread:$0]  %s41_s29, 12288, %s43_s30, [#allocation5], %s1684_s7, %s1684_s7, %s1685_s8  }
   0xc   :  { %s56_s10 = sshll.u32 %s1686_s9, 4  ;;  %s57_s10 = int_to_ptr.vmem [resolvable:$true] %s56_s10 }
   0xd   :  { %59 = dma.hbm_to_vmem [thread:$0]  %s55_s0, 512, %s57_s10, [#allocation8]  }
   0xe   :  { %1673 = dma.done.wait [#allocation3], 128  }
   0xf   :  { %1674 = vsyncadd [#allocation3], 4294967168 }
  0x10   :  { %1675 = dma.done.wait [#allocation5], 13312  }
  0x11   :  { %1676 = vsyncadd [#allocation5], 4294953984 }
  0x12   :  { %1677 = dma.done.wait [#allocation8], 512  }
  0x13   :  { %1678 = vsyncadd [#allocation8], 4294966784  ;;  %v1059_v0 = vld [vmem:[#allocation4 + $0x20] sm:$0xf]  ;;  %v1467_v1 = vld [vmem:[#allocation4 + $0x2c] sm:$0xf0] }
  0x14   :  { %v1465_v2 = vld [vmem:[#allocation4 + $0x24] sm:$0xf]  ;;  %v1060_v3 = vor.u32 %v1467_v1, %v1059_v0  ;;  %v1061_v4 = vld [vmem:[#allocation4 + $0x30] sm:$0xf0]  ;;  %v1067_v5 = vld [vmem:[#allocation4 + $0x28] sm:$0xf] }
  0x15   :  { %v1468_v6 = vld [vmem:[#allocation4 + $0x34] sm:$0xf0]  ;;  %v1064_v7 = vor.u32 %v1465_v2, %v1061_v4  ;;  %v1466_v9 = vld [vmem:[#allocation4 + $0x2c] sm:$0xf]  ;;  %v1069_v10 = vld [vmem:[#allocation4 + $0x38] sm:$0xf0] }
  0x16   :  { %v1068_v8 = vor.u32 %v1468_v6, %v1067_v5  ;;  %v1043_v11 = vld [vmem:[#allocation4] sm:$0xf]  ;;  %152 = vmatpush.bf16.msra.mxu0 %v1060_v3  ;;  %v1072_v12 = vor.u32 %v1466_v9, %v1069_v10  ;;  %v1463_v13 = vld [vmem:[#allocation4 + $0xc] sm:$0xf0]  ;;  %v1461_v14 = vld [vmem:[#allocation4 + $0x4] sm:$0xf] }
  0x17   :  { %v1045_v15 = vld [vmem:[#allocation4 + $0x10] sm:$0xf0]  ;;  %165 = vmatpush.bf16.msra.mxu1 %v1064_v7  ;;  %v1044_v16 = vor.u32 %v1463_v13, %v1043_v11  ;;  %v1051_v18 = vld [vmem:[#allocation4 + $0x8] sm:$0xf]  ;;  %v1464_v19 = vld [vmem:[#allocation4 + $0x14] sm:$0xf0] }
  0x18   :  { %178 = vmatpush.bf16.msra.mxu2 %v1068_v8  ;;  %v1048_v17 = vor.u32 %v1461_v14, %v1045_v15  ;;  %v1462_v20 = vld [vmem:[#allocation4 + $0xc] sm:$0xf]  ;;  %191 = vmatpush.bf16.msra.mxu3 %v1072_v12  ;;  %v1052_v21 = vor.u32 %v1464_v19, %v1051_v18  ;;  %v1053_v22 = vld [vmem:[#allocation4 + $0x18] sm:$0xf0]  ;;  %vm142_vm0 = vcmask 261120  }
  0x19   :  { %v77_v23 = vld [vmem:[#allocation2] sm:$0xff]  ;;  %v1163_v24 = vld [vmem:[#allocation6 + $0xa8] sm:$0xf]  ;;  %v1056_v25 = vor.u32 %v1462_v20, %v1053_v22  ;;  %v1491_v27 = vld [vmem:[#allocation6 + $0xb0] sm:$0xf0] }
  0x1a   :  { %v78_v26 = vpack.c.bf16 %v77_v23, %v77_v23  ;;  %v1259_v28 = vld [vmem:[#allocation6 + $0x168] sm:$0xf]  ;;  %v1515_v29 = vld [vmem:[#allocation6 + $0x170] sm:$0xf0]  ;;  %153 = vmatpush.bf16.msra.mxu0 %v1044_v16  ;;  %v1164_v30 = vor.u32 %v1491_v27, %v1163_v24  ;;  %v1151_v32 = vld [vmem:[#allocation6 + $0x90] sm:$0xf] }
  0x1b   :  { %v1260_v31 = vor.u32 %v1515_v29, %v1259_v28  ;;  %v1488_v33 = vld [vmem:[#allocation6 + $0x98] sm:$0xf0]  ;;  %v1247_v34 = vld [vmem:[#allocation6 + $0x150] sm:$0xf]  ;;  %166 = vmatpush.bf16.msra.mxu1 %v1048_v17  ;;  %v1355_v36 = vld [vmem:[#allocation6 + $0x228] sm:$0xf] }
  0x1c   :  { %179 = vmatpush.bf16.msra.mxu2 %v1052_v21  ;;  %v1512_v35 = vld [vmem:[#allocation6 + $0x158] sm:$0xf0]  ;;  %v1539_v37 = vld [vmem:[#allocation6 + $0x230] sm:$0xf0]  ;;  %192 = vmatpush.bf16.msra.mxu3 %v1056_v25  ;;  %v1152_v38 = vor.u32 %v1488_v33, %v1151_v32  ;;  %v1451_v40 = vld [vmem:[#allocation6 + $0x2e8] sm:$0xf] }
  0x1d   :  { %v1356_v39 = vor.u32 %v1539_v37, %v1355_v36  ;;  %v1563_v41 = vld [vmem:[#allocation6 + $0x2f0] sm:$0xf0]  ;;  %v1139_v42 = vld [vmem:[#allocation6 + $0x78] sm:$0xf]  ;;  %1073 = vmatmul.msk.bf16.vlgmr.msra.gmra.mxu0 %vm142_vm0, %v78_v26  ;;  %v1248_v43 = vor.u32 %v1512_v35, %v1247_v34  ;;  %v1485_v45 = vld [vmem:[#allocation6 + $0x80] sm:$0xf0] }
  0x1e   :  { %853 = vmatpush.bf16.msrb.mxu0 %v1164_v30  ;;  %v1452_v44 = vor.u32 %v1563_v41, %v1451_v40  ;;  %v1235_v46 = vld [vmem:[#allocation6 + $0x138] sm:$0xf]  ;;  %v1509_v47 = vld [vmem:[#allocation6 + $0x140] sm:$0xf0]  ;;  %1074 = vmatmul.msk.bf16.vlgmr.msra.gmra.mxu1 %vm142_vm0, %v78_v26  ;;  %v1343_v48 = vld [vmem:[#allocation6 + $0x210] sm:$0xf]  ;;  %v1140_v53 = vor.u32 %v1485_v45, %v1139_v42 }
  0x1f   :  { %866 = vmatpush.bf16.msrb.mxu1 %v1260_v31  ;;  %1075 = vmatmul.msk.bf16.vlgmr.msra.gmra.mxu2 %vm142_vm0, %v78_v26  ;;  %v1536_v49 = vld [vmem:[#allocation6 + $0x218] sm:$0xf0]  ;;  %v1439_v50 = vld [vmem:[#allocation6 + $0x2d0] sm:$0xf]  ;;  %v1127_v55 = vld [vmem:[#allocation6 + $0x60] sm:$0xf]  ;;  %v1236_v58 = vor.u32 %v1509_v47, %v1235_v46 }
  0x20   :  { %1076 = vmatmul.msk.bf16.vlgmr.msra.gmra.mxu3 %vm142_vm0, %v78_v26  ;;  %879 = vmatpush.bf16.msrb.mxu2 %v1356_v39  ;;  %v1344_v51 = vor.u32 %v1536_v49, %v1343_v48  ;;  %v1560_v52 = vld [vmem:[#allocation6 + $0x2d8] sm:$0xf0]  ;;  %v1482_v56 = vld [vmem:[#allocation6 + $0x68] sm:$0xf0]  ;;  %v1331_v57 = vld [vmem:[#allocation6 + $0x1f8] sm:$0xf] }
  0x21   :  { %892 = vmatpush.bf16.msrb.mxu3 %v1452_v44  ;;  %v1440_v54 = vor.u32 %v1560_v52, %v1439_v50  ;;  %v1533_v59 = vld [vmem:[#allocation6 + $0x200] sm:$0xf0]  ;;  %v1427_v60 = vld [vmem:[#allocation6 + $0x2b8] sm:$0xf]  ;;  %v1223_v62 = vld [vmem:[#allocation6 + $0x120] sm:$0xf]  ;;  %v1128_v1 = vor.u32 %v1482_v56, %v1127_v55 }
  0x22   :  { %854 = vmatpush.bf16.msrb.mxu0 %v1152_v38  ;;  %v1557_v61 = vld [vmem:[#allocation6 + $0x2c0] sm:$0xf0]  ;;  %v1506_v63 = vld [vmem:[#allocation6 + $0x128] sm:$0xf0]  ;;  %v1332_v0 = vor.u32 %v1533_v59, %v1331_v57  ;;  %v1115_v3 = vld [vmem:[#allocation6 + $0x48] sm:$0xf] }
  0x23   :  { %867 = vmatpush.bf16.msrb.mxu1 %v1248_v43  ;;  %v1428_v2 = vor.u32 %v1557_v61, %v1427_v60  ;;  %v1319_v4 = vld [vmem:[#allocation6 + $0x1e0] sm:$0xf]  ;;  %v1530_v5 = vld [vmem:[#allocation6 + $0x1e8] sm:$0xf0]  ;;  %v1224_v6 = vor.u32 %v1506_v63, %v1223_v62  ;;  %v1479_v7 = vld [vmem:[#allocation6 + $0x50] sm:$0xf0] }
  0x24   :  { %880 = vmatpush.bf16.msrb.mxu2 %v1344_v51  ;;  %v1415_v8 = vld [vmem:[#allocation6 + $0x2a0] sm:$0xf]  ;;  %v1554_v9 = vld [vmem:[#allocation6 + $0x2a8] sm:$0xf0]  ;;  %v1211_v10 = vld [vmem:[#allocation6 + $0x108] sm:$0xf]  ;;  %v1320_v12 = vor.u32 %v1530_v5, %v1319_v4  ;;  %v1116_v13 = vor.u32 %v1479_v7, %v1115_v3 }
  0x25   :  { %893 = vmatpush.bf16.msrb.mxu3 %v1440_v54  ;;  %v1503_v11 = vld [vmem:[#allocation6 + $0x110] sm:$0xf0]  ;;  %v1416_v14 = vor.u32 %v1554_v9, %v1415_v8  ;;  %v1103_v15 = vld [vmem:[#allocation6 + $0x30] sm:$0xf]  ;;  %v1307_v16 = vld [vmem:[#allocation6 + $0x1c8] sm:$0xf] }
  0x26   :  { %855 = vmatpush.bf16.msrb.mxu0 %v1140_v53  ;;  %v1527_v17 = vld [vmem:[#allocation6 + $0x1d0] sm:$0xf0]  ;;  %v1212_v18 = vor.u32 %v1503_v11, %v1211_v10  ;;  %v1476_v19 = vld [vmem:[#allocation6 + $0x38] sm:$0xf0]  ;;  %v1403_v20 = vld [vmem:[#allocation6 + $0x288] sm:$0xf] }
  0x27   :  { %868 = vmatpush.bf16.msrb.mxu1 %v1236_v58  ;;  %v1551_v21 = vld [vmem:[#allocation6 + $0x290] sm:$0xf0]  ;;  %v1199_v22 = vld [vmem:[#allocation6 + $0xf0] sm:$0xf]  ;;  %v1500_v23 = vld [vmem:[#allocation6 + $0xf8] sm:$0xf0]  ;;  %v1308_v24 = vor.u32 %v1527_v17, %v1307_v16  ;;  %v1104_v25 = vor.u32 %v1476_v19, %v1103_v15 }
  0x28   :  { %881 = vmatpush.bf16.msrb.mxu2 %v1332_v0  ;;  %v1404_v26 = vor.u32 %v1551_v21, %v1403_v20  ;;  %v1091_v27 = vld [vmem:[#allocation6 + $0x18] sm:$0xf]  ;;  %v1295_v28 = vld [vmem:[#allocation6 + $0x1b0] sm:$0xf]  ;;  %v1524_v29 = vld [vmem:[#allocation6 + $0x1b8] sm:$0xf0]  ;;  %v1200_v30 = vor.u32 %v1500_v23, %v1199_v22 }
  0x29   :  { %894 = vmatpush.bf16.msrb.mxu3 %v1428_v2  ;;  %v1473_v31 = vld [vmem:[#allocation6 + $0x20] sm:$0xf0]  ;;  %v1391_v32 = vld [vmem:[#allocation6 + $0x270] sm:$0xf]  ;;  %v1548_v33 = vld [vmem:[#allocation6 + $0x278] sm:$0xf0]  ;;  %v1296_v36 = vor.u32 %v1524_v29, %v1295_v28 }
  0x2a   :  { %856 = vmatpush.bf16.msrb.mxu0 %v1128_v1  ;;  %v1187_v34 = vld [vmem:[#allocation6 + $0xd8] sm:$0xf]  ;;  %v1497_v35 = vld [vmem:[#allocation6 + $0xe0] sm:$0xf0]  ;;  %v1079_v37 = vld [vmem:[#allocation6] sm:$0xf]  ;;  %v1092_v38 = vor.u32 %v1473_v31, %v1091_v27  ;;  %v1392_v39 = vor.u32 %v1548_v33, %v1391_v32 }
  0x2b   :  { %869 = vmatpush.bf16.msrb.mxu1 %v1224_v6  ;;  %v1470_v40 = vld [vmem:[#allocation6 + $0x8] sm:$0xf0]  ;;  %v1283_v41 = vld [vmem:[#allocation6 + $0x198] sm:$0xf]  ;;  %v1521_v42 = vld [vmem:[#allocation6 + $0x1a0] sm:$0xf0]  ;;  %v1188_v43 = vor.u32 %v1497_v35, %v1187_v34 }
  0x2c   :  { %882 = vmatpush.bf16.msrb.mxu2 %v1320_v12  ;;  %v1175_v44 = vld [vmem:[#allocation6 + $0xc0] sm:$0xf]  ;;  %v1379_v45 = vld [vmem:[#allocation6 + $0x258] sm:$0xf]  ;;  %v1545_v46 = vld [vmem:[#allocation6 + $0x260] sm:$0xf0]  ;;  %v1284_v52 = vor.u32 %v1521_v42, %v1283_v41  ;;  %v1080_v53 = vor.u32 %v1470_v40, %v1079_v37 }
  0x2d   :  { %895 = vmatpush.bf16.msrb.mxu3 %v1416_v14  ;;  %v1494_v47 = vld [vmem:[#allocation6 + $0xc8] sm:$0xf0]  ;;  %v1165_v49 = vld [vmem:[#allocation6 + $0xb4] sm:$0xf0]  ;;  %v1380_v54 = vor.u32 %v1545_v46, %v1379_v45  ;;  %v1487_v55 = vld [vmem:[#allocation6 + $0x94] sm:$0xf] }
  0x2e   :  { %857 = vmatpush.bf16.msrb.mxu0 %v1116_v13  ;;  %v1490_v48 = vld [vmem:[#allocation6 + $0xac] sm:$0xf]  ;;  %v1261_v51 = vld [vmem:[#allocation6 + $0x174] sm:$0xf0]  ;;  %v1271_v56 = vld [vmem:[#allocation6 + $0x180] sm:$0xf]  ;;  %v1176_v59 = vor.u32 %v1494_v47, %v1175_v44 }
  0x2f   :  { %870 = vmatpush.bf16.msrb.mxu1 %v1212_v18  ;;  %v1514_v50 = vld [vmem:[#allocation6 + $0x16c] sm:$0xf]  ;;  %v1367_v58 = vld [vmem:[#allocation6 + $0x240] sm:$0xf]  ;;  %v1168_v60 = vor.u32 %v1490_v48, %v1165_v49  ;;  %v1357_v63 = vld [vmem:[#allocation6 + $0x234] sm:$0xf0] }
  0x30   :  { %883 = vmatpush.bf16.msrb.mxu2 %v1308_v24  ;;  %v1518_v57 = vld [vmem:[#allocation6 + $0x188] sm:$0xf0]  ;;  %v1264_v0 = vor.u32 %v1514_v50, %v1261_v51  ;;  %v1153_v1 = vld [vmem:[#allocation6 + $0x9c] sm:$0xf0]  ;;  %v1453_v3 = vld [vmem:[#allocation6 + $0x2f4] sm:$0xf0] }
  0x31   :  { %896 = vmatpush.bf16.msrb.mxu3 %v1404_v26  ;;  %v1542_v61 = vld [vmem:[#allocation6 + $0x248] sm:$0xf0]  ;;  %v1511_v4 = vld [vmem:[#allocation6 + $0x154] sm:$0xf]  ;;  %v1249_v5 = vld [vmem:[#allocation6 + $0x15c] sm:$0xf0]  ;;  %v1272_v6 = vor.u32 %v1518_v57, %v1271_v56  ;;  %v1156_v9 = vor.u32 %v1487_v55, %v1153_v1 }
  0x32   :  { %858 = vmatpush.bf16.msrb.mxu0 %v1104_v25  ;;  %v1538_v62 = vld [vmem:[#allocation6 + $0x22c] sm:$0xf]  ;;  %v1368_v7 = vor.u32 %v1542_v61, %v1367_v58  ;;  %v1484_v11 = vld [vmem:[#allocation6 + $0x7c] sm:$0xf]  ;;  %v1535_v12 = vld [vmem:[#allocation6 + $0x214] sm:$0xf]  ;;  %v1252_v14 = vor.u32 %v1511_v4, %v1249_v5 }
  0x33   :  { %871 = vmatpush.bf16.msrb.mxu1 %v1200_v30  ;;  %v1562_v2 = vld [vmem:[#allocation6 + $0x2ec] sm:$0xf]  ;;  %v1360_v8 = vor.u32 %v1538_v62, %v1357_v63  ;;  %v1345_v13 = vld [vmem:[#allocation6 + $0x21c] sm:$0xf0]  ;;  %v1141_v15 = vld [vmem:[#allocation6 + $0x84] sm:$0xf0] }
  0x34   :  { %884 = vmatpush.bf16.msrb.mxu2 %v1296_v36  ;;  %v1456_v10 = vor.u32 %v1562_v2, %v1453_v3  ;;  %v1559_v16 = vld [vmem:[#allocation6 + $0x2d4] sm:$0xf]  ;;  %v1441_v17 = vld [vmem:[#allocation6 + $0x2dc] sm:$0xf0]  ;;  %v1508_v18 = vld [vmem:[#allocation6 + $0x13c] sm:$0xf]  ;;  %v1348_v20 = vor.u32 %v1535_v12, %v1345_v13  ;;  %v1144_v21 = vor.u32 %v1484_v11, %v1141_v15 }
  0x35   :  { %897 = vmatpush.bf16.msrb.mxu3 %v1392_v39  ;;  %v1237_v19 = vld [vmem:[#allocation6 + $0x144] sm:$0xf0]  ;;  %v1444_v22 = vor.u32 %v1559_v16, %v1441_v17  ;;  %v1481_v23 = vld [vmem:[#allocation6 + $0x64] sm:$0xf]  ;;  %v1532_v24 = vld [vmem:[#allocation6 + $0x1fc] sm:$0xf] }
  0x36   :  { %859 = vmatpush.bf16.msrb.mxu0 %v1092_v38  ;;  %v1333_v25 = vld [vmem:[#allocation6 + $0x204] sm:$0xf0]  ;;  %v1240_v26 = vor.u32 %v1508_v18, %v1237_v19  ;;  %v1129_v27 = vld [vmem:[#allocation6 + $0x6c] sm:$0xf0]  ;;  %v1556_v28 = vld [vmem:[#allocation6 + $0x2bc] sm:$0xf] }
  0x37   :  { %872 = vmatpush.bf16.msrb.mxu1 %v1188_v43  ;;  %v1429_v29 = vld [vmem:[#allocation6 + $0x2c4] sm:$0xf0]  ;;  %v1505_v30 = vld [vmem:[#allocation6 + $0x124] sm:$0xf]  ;;  %v1225_v31 = vld [vmem:[#allocation6 + $0x12c] sm:$0xf0]  ;;  %v1336_v32 = vor.u32 %v1532_v24, %v1333_v25  ;;  %v1132_v33 = vor.u32 %v1481_v23, %v1129_v27 }
  0x38   :  { %885 = vmatpush.bf16.msrb.mxu2 %v1284_v52  ;;  %v1432_v34 = vor.u32 %v1556_v28, %v1429_v29  ;;  %v1478_v35 = vld [vmem:[#allocation6 + $0x4c] sm:$0xf]  ;;  %v1529_v36 = vld [vmem:[#allocation6 + $0x1e4] sm:$0xf]  ;;  %v1321_v37 = vld [vmem:[#allocation6 + $0x1ec] sm:$0xf0]  ;;  %v1228_v38 = vor.u32 %v1505_v30, %v1225_v31 }
  0x39   :  { %898 = vmatpush.bf16.msrb.mxu3 %v1380_v54  ;;  %v1117_v39 = vld [vmem:[#allocation6 + $0x54] sm:$0xf0]  ;;  %v1553_v40 = vld [vmem:[#allocation6 + $0x2a4] sm:$0xf]  ;;  %v1417_v41 = vld [vmem:[#allocation6 + $0x2ac] sm:$0xf0]  ;;  %v1324_v44 = vor.u32 %v1529_v36, %v1321_v37 }
  0x3a   :  { %860 = vmatpush.bf16.msrb.mxu0 %v1080_v53  ;;  %v1502_v42 = vld [vmem:[#allocation6 + $0x10c] sm:$0xf]  ;;  %v1213_v43 = vld [vmem:[#allocation6 + $0x114] sm:$0xf0]  ;;  %v1120_v45 = vor.u32 %v1478_v35, %v1117_v39  ;;  %v1420_v46 = vor.u32 %v1553_v40, %v1417_v41  ;;  %v1475_v48 = vld [vmem:[#allocation6 + $0x34] sm:$0xf] }
  0x3b   :  { %873 = vmatpush.bf16.msrb.mxu1 %v1176_v59  ;;  %v1216_v47 = vor.u32 %v1502_v42, %v1213_v43  ;;  %v1105_v49 = vld [vmem:[#allocation6 + $0x3c] sm:$0xf0]  ;;  %v1499_v50 = vld [vmem:[#allocation6 + $0xf4] sm:$0xf]  ;;  %v1526_v54 = vld [vmem:[#allocation6 + $0x1cc] sm:$0xf] }
  0x3c   :  { %886 = vmatpush.bf16.msrb.mxu2 %v1272_v6  ;;  %v1201_v51 = vld [vmem:[#allocation6 + $0xfc] sm:$0xf0]  ;;  %v1108_v52 = vor.u32 %v1475_v48, %v1105_v49  ;;  %v1309_v55 = vld [vmem:[#allocation6 + $0x1d4] sm:$0xf0]  ;;  %v1550_v56 = vld [vmem:[#allocation6 + $0x28c] sm:$0xf] }
  0x3d   :  { %899 = vmatpush.bf16.msrb.mxu3 %v1368_v7  ;;  %v1204_v53 = vor.u32 %v1499_v50, %v1201_v51  ;;  %v1312_v57 = vor.u32 %v1526_v54, %v1309_v55  ;;  %v1405_v58 = vld [vmem:[#allocation6 + $0x294] sm:$0xf0]  ;;  %v1093_v61 = vld [vmem:[#allocation6 + $0x24] sm:$0xf0]  ;;  %v1496_v62 = vld [vmem:[#allocation6 + $0xdc] sm:$0xf] }
  0x3e   :  { %905 = vmatpush.bf16.msra.mxu0 %v1168_v60  ;;  %v1408_v59 = vor.u32 %v1550_v56, %v1405_v58  ;;  %v1472_v60 = vld [vmem:[#allocation6 + $0x1c] sm:$0xf]  ;;  %v1523_v2 = vld [vmem:[#allocation6 + $0x1b4] sm:$0xf]  ;;  %v1297_v3 = vld [vmem:[#allocation6 + $0x1bc] sm:$0xf0] }
  0x3f   :  { %918 = vmatpush.bf16.msra.mxu1 %v1264_v0  ;;  %v1096_v63 = vor.u32 %v1472_v60, %v1093_v61  ;;  %v1189_v0 = vld [vmem:[#allocation6 + $0xe4] sm:$0xf0]  ;;  %v1547_v4 = vld [vmem:[#allocation6 + $0x274] sm:$0xf]  ;;  %v1300_v5 = vor.u32 %v1523_v2, %v1297_v3  ;;  %v1393_v6 = vld [vmem:[#allocation6 + $0x27c] sm:$0xf0] }
  0x40   :  { %931 = vmatpush.bf16.msra.mxu2 %v1360_v8  ;;  %v1192_v1 = vor.u32 %v1496_v62, %v1189_v0  ;;  %v1396_v7 = vor.u32 %v1547_v4, %v1393_v6  ;;  %v1469_v8 = vld [vmem:[#allocation6 + $0x4] sm:$0xf]  ;;  %v1177_v12 = vld [vmem:[#allocation6 + $0xcc] sm:$0xf0]  ;;  %v1285_v15 = vld [vmem:[#allocation6 + $0x1a4] sm:$0xf0] }
  0x41   :  { %944 = vmatpush.bf16.msra.mxu3 %v1456_v10  ;;  %v1493_v11 = vld [vmem:[#allocation6 + $0xc4] sm:$0xf]  ;;  %v1544_v17 = vld [vmem:[#allocation6 + $0x25c] sm:$0xf]  ;;  %v1381_v18 = vld [vmem:[#allocation6 + $0x264] sm:$0xf0] }
  0x42   :  { %906 = vmatpush.bf16.msra.mxu0 %v1156_v9  ;;  %v1081_v9 = vld [vmem:[#allocation6 + $0xc] sm:$0xf0]  ;;  %v1180_v13 = vor.u32 %v1493_v11, %v1177_v12  ;;  %v1384_v19 = vor.u32 %v1544_v17, %v1381_v18  ;;  %v1541_v23 = vld [vmem:[#allocation6 + $0x244] sm:$0xf]  ;;  %v1516_v36 = vld [vmem:[#allocation6 + $0x178] sm:$0xf0] }
  0x43   :  { %919 = vmatpush.bf16.msra.mxu1 %v1252_v14  ;;  %v1084_v10 = vor.u32 %v1469_v8, %v1081_v9  ;;  %v1520_v14 = vld [vmem:[#allocation6 + $0x19c] sm:$0xf]  ;;  %v1369_v24 = vld [vmem:[#allocation6 + $0x24c] sm:$0xf0]  ;;  %v1513_v48 = vld [vmem:[#allocation6 + $0x160] sm:$0xf0] }
  0x44   :  { %932 = vmatpush.bf16.msra.mxu2 %v1348_v20  ;;  %v1288_v16 = vor.u32 %v1520_v14, %v1285_v15  ;;  %v1517_v20 = vld [vmem:[#allocation6 + $0x184] sm:$0xf]  ;;  %v1372_v25 = vor.u32 %v1541_v23, %v1369_v24  ;;  %v1267_v35 = vld [vmem:[#allocation6 + $0x170] sm:$0xf]  ;;  %v1540_v55 = vld [vmem:[#allocation6 + $0x238] sm:$0xf0] }
  0x45   :  { %945 = vmatpush.bf16.msra.mxu3 %v1444_v22  ;;  %v1268_v43 = vor.u32 %v1516_v36, %v1267_v35  ;;  %v1363_v54 = vld [vmem:[#allocation6 + $0x230] sm:$0xf]  ;;  %v1564_v60 = vld [vmem:[#allocation6 + $0x2f8] sm:$0xf0]  ;;  %v1147_v61 = vld [vmem:[#allocation6 + $0x80] sm:$0xf] }
  0x46   :  { %907 = vmatpush.bf16.msra.mxu0 %v1144_v21  ;;  %v1273_v21 = vld [vmem:[#allocation6 + $0x18c] sm:$0xf0]  ;;  %v1486_v62 = vld [vmem:[#allocation6 + $0x88] sm:$0xf0]  ;;  %v1243_v0 = vld [vmem:[#allocation6 + $0x140] sm:$0xf]  ;;  %v1364_v3 = vor.u32 %v1540_v55, %v1363_v54 }
  0x47   :  { %920 = vmatpush.bf16.msra.mxu1 %v1240_v26  ;;  %v1276_v22 = vor.u32 %v1517_v20, %v1273_v21  ;;  %v79_v26 = vld [vmem:[#allocation7] ss:$8 sm:$0xf]  ;;  %v1148_v6 = vor.u32 %v1486_v62, %v1147_v61  ;;  %v1537_v8 = vld [vmem:[#allocation6 + $0x220] sm:$0xf0] }
  0x48   :  { %933 = vmatpush.bf16.msra.mxu2 %v1336_v32  ;;  %v94_v27 = vperm.slane %v79_v26, 0  ;;  %v95_v28 = vperm.slane %v79_v26, 1  ;;  %v1171_v32 = vld [vmem:[#allocation6 + $0xb0] sm:$0xf]  ;;  %v96_v39 = vperm.slane %v79_v26, 2  ;;  %v97_v42 = vperm.slane %v79_v26, 3 }
  0x49   :  { %946 = vmatpush.bf16.msra.mxu3 %v1432_v34  ;;  %v1459_v56 = vld [vmem:[#allocation6 + $0x2f0] sm:$0xf]  ;;  %v1447_v9 = vld [vmem:[#allocation6 + $0x2d8] sm:$0xf]  ;;  %v1561_v12 = vld [vmem:[#allocation6 + $0x2e0] sm:$0xf0] }
  0x4a   :  { %908 = vmatpush.bf16.msra.mxu0 %v1132_v33  ;;  %v1492_v33 = vld [vmem:[#allocation6 + $0xb8] sm:$0xf0]  ;;  %v1483_v14 = vld [vmem:[#allocation6 + $0x70] sm:$0xf0]  ;;  %v1231_v15 = vld [vmem:[#allocation6 + $0x128] sm:$0xf]  ;;  %v1448_v20 = vor.u32 %v1561_v12, %v1447_v9 }
  0x4b   :  { %921 = vmatpush.bf16.msra.mxu1 %v1228_v38  ;;  %v1172_v40 = vor.u32 %v1492_v33, %v1171_v32  ;;  %v1534_v23 = vld [vmem:[#allocation6 + $0x208] sm:$0xf0]  ;;  %v1327_v33 = vld [vmem:[#allocation6 + $0x1e8] sm:$0xf]  ;;  %v1195_v55 = vld [vmem:[#allocation6 + $0xe0] sm:$0xf] }
  0x4c   :  { %934 = vmatpush.bf16.msra.mxu2 %v1324_v44  ;;  %v1159_v44 = vld [vmem:[#allocation6 + $0x98] sm:$0xf]  ;;  %v1558_v26 = vld [vmem:[#allocation6 + $0x2c8] sm:$0xf0] }
  0x4d   :  { %947 = vmatpush.bf16.msra.mxu3 %v1420_v46  ;;  %v1474_v54 = vld [vmem:[#allocation6 + $0x28] sm:$0xf0] }
  0x4e   :  { %909 = vmatpush.bf16.msra.mxu0 %v1120_v45  ;;  %v1489_v45 = vld [vmem:[#allocation6 + $0xa0] sm:$0xf0]  ;;  %v1522_v9 = vld [vmem:[#allocation6 + $0x1a8] sm:$0xf0] }
  0x4f   :  { %922 = vmatpush.bf16.msra.mxu1 %v1216_v47  ;;  %v1255_v47 = vld [vmem:[#allocation6 + $0x158] sm:$0xf] }
  0x50   :  { %935 = vmatpush.bf16.msra.mxu2 %v1312_v57 }
  0x51   :  { %948 = vmatpush.bf16.msra.mxu3 %v1408_v59  ;;  %v1256_v59 = vor.u32 %v1513_v48, %v1255_v47  ;;  %v1315_v47 = vld [vmem:[#allocation6 + $0x1d0] sm:$0xf]  ;;  %v1528_v48 = vld [vmem:[#allocation6 + $0x1d8] sm:$0xf0] }
  0x52   :  { %910 = vmatpush.bf16.msra.mxu0 %v1108_v52 }
  0x53   :  { %923 = vmatpush.bf16.msra.mxu1 %v1204_v53  ;;  %v1160_v53 = vor.u32 %v1489_v45, %v1159_v44 }
  0x54   :  { %936 = vmatpush.bf16.msra.mxu2 %v1300_v5  ;;  %v1460_v5 = vor.u32 %v1564_v60, %v1459_v56  ;;  %v1498_v56 = vld [vmem:[#allocation6 + $0xe8] sm:$0xf0]  ;;  %v1525_v60 = vld [vmem:[#allocation6 + $0x1c0] sm:$0xf0] }
  0x55   :  { %949 = vmatpush.bf16.msra.mxu3 %v1396_v7  ;;  %v1351_v7 = vld [vmem:[#allocation6 + $0x218] sm:$0xf]  ;;  %v1196_v62 = vor.u32 %v1498_v56, %v1195_v55 }
  0x56   :  { %911 = vmatpush.bf16.msra.mxu0 %v1096_v63  ;;  %v1352_v18 = vor.u32 %v1537_v8, %v1351_v7  ;;  %v1291_v8 = vld [vmem:[#allocation6 + $0x1a0] sm:$0xf] }
  0x57   :  { %924 = vmatpush.bf16.msra.mxu1 %v1192_v1  ;;  %v1510_v1 = vld [vmem:[#allocation6 + $0x148] sm:$0xf0] }
  0x58   :  { %937 = vmatpush.bf16.msra.mxu2 %v1288_v16  ;;  %v1244_v11 = vor.u32 %v1510_v1, %v1243_v0  ;;  %v1507_v16 = vld [vmem:[#allocation6 + $0x130] sm:$0xf0]  ;;  %v1549_v0 = vld [vmem:[#allocation6 + $0x280] sm:$0xf0]  ;;  %v1087_v1 = vld [vmem:[#allocation6 + $0x8] sm:$0xf] }
  0x59   :  { %950 = vmatpush.bf16.msra.mxu3 %v1384_v19  ;;  %v1232_v24 = vor.u32 %v1507_v16, %v1231_v15  ;;  %v1292_v15 = vor.u32 %v1522_v9, %v1291_v8 }
  0x5a   :  { %912 = vmatpush.bf16.msra.mxu0 %v1084_v10 }
  0x5b   :  { %925 = vmatpush.bf16.msra.mxu1 %v1180_v13  ;;  %v1135_v13 = vld [vmem:[#allocation6 + $0x68] sm:$0xf] }
  0x5c   :  { %938 = vmatpush.bf16.msra.mxu2 %v1276_v22  ;;  %v1136_v21 = vor.u32 %v1483_v14, %v1135_v13  ;;  %v1339_v22 = vld [vmem:[#allocation6 + $0x200] sm:$0xf]  ;;  %v1546_v14 = vld [vmem:[#allocation6 + $0x268] sm:$0xf0] }
  0x5d   :  { %951 = vmatpush.bf16.msra.mxu3 %v1372_v25  ;;  %v1435_v25 = vld [vmem:[#allocation6 + $0x2c0] sm:$0xf] }
  0x5e   :  { %v1436_v32 = vor.u32 %v1558_v26, %v1435_v25  ;;  %v1387_v13 = vld [vmem:[#allocation6 + $0x260] sm:$0xf] }
  0x5f   :  { %v1388_v16 = vor.u32 %v1546_v14, %v1387_v13 }
  0x9a   :  { %v155_v29 = vpop.f32.mrf.mxu0 }
  0x9b   :  { %v156_v30 = vadd.f32 %v155_v29, %v94_v27  ;;  %v168_v31 = vpop.f32.mrf.mxu1  ;;  %v1123_v27 = vld [vmem:[#allocation6 + $0x50] sm:$0xf] }
  0x9c   :  { %v169_v34 = vadd.f32 %v168_v31, %v95_v28  ;;  %v1480_v28 = vld [vmem:[#allocation6 + $0x58] sm:$0xf0]  ;;  %v1219_v29 = vld [vmem:[#allocation6 + $0x110] sm:$0xf]  ;;  %v1340_v31 = vor.u32 %v1534_v23, %v1339_v22 }
  0x9d   :  { %v198_v37 = vmax.f32 %v156_v30, 0.0  ;;  %v1504_v30 = vld [vmem:[#allocation6 + $0x118] sm:$0xf0]  ;;  %v1124_v35 = vor.u32 %v1480_v28, %v1123_v27 }
  0x9e   :  { %v199_v38 = vmax.f32 %v169_v34, 0.0  ;;  %v1531_v34 = vld [vmem:[#allocation6 + $0x1f0] sm:$0xf0]  ;;  %v1220_v36 = vor.u32 %v1504_v30, %v1219_v29 }
  0x9f   :  { %v1729_v41 = vpack.c.bf16 %v198_v37, %v198_v37  ;;  %v1423_v37 = vld [vmem:[#allocation6 + $0x2a8] sm:$0xf]  ;;  %v1328_v44 = vor.u32 %v1531_v34, %v1327_v33 }
  0xa0   :  { %v1731_v46 = vpack.c.bf16 %v199_v38, %v199_v38  ;;  %v1555_v38 = vld [vmem:[#allocation6 + $0x2b0] sm:$0xf0] }
  0xa1   :  { %861 = vmatmul.bf16.vlgmr.msrb.gmra.mxu0 %v1729_v41  ;;  %v1424_v45 = vor.u32 %v1555_v38, %v1423_v37 }
  0xa2   :  { %v181_v49 = vpop.f32.mrf.mxu2  ;;  %874 = vmatmul.bf16.vlgmr.msrb.gmra.mxu1 %v1731_v46  ;;  %v157_v52 = vpop.f32.mrf.mxu0  ;;  %957 = vmatpush.bf16.msrb.mxu0 %v1172_v40  ;;  %v1477_v40 = vld [vmem:[#allocation6 + $0x40] sm:$0xf0] }
  0xa3   :  { %v182_v50 = vadd.f32 %v181_v49, %v96_v39  ;;  %v194_v51 = vpop.f32.mrf.mxu3  ;;  %970 = vmatpush.bf16.msrb.mxu1 %v1268_v43  ;;  %v170_v58 = vpop.f32.mrf.mxu1  ;;  %v1111_v39 = vld [vmem:[#allocation6 + $0x38] sm:$0xf]  ;;  %v1501_v43 = vld [vmem:[#allocation6 + $0x100] sm:$0xf0]  ;;  %v1552_v52 = vld [vmem:[#allocation6 + $0x298] sm:$0xf0] }
  0xa4   :  { %v195_v57 = vadd.f32 %v194_v51, %v97_v42  ;;  %v1207_v42 = vld [vmem:[#allocation6 + $0xf8] sm:$0xf]  ;;  %v1112_v49 = vor.u32 %v1477_v40, %v1111_v39  ;;  %v1411_v51 = vld [vmem:[#allocation6 + $0x290] sm:$0xf] }
  0xa5   :  { %v200_v63 = vmax.f32 %v182_v50, 0.0  ;;  %v1208_v50 = vor.u32 %v1501_v43, %v1207_v42  ;;  %v1412_v58 = vor.u32 %v1552_v52, %v1411_v51 }
  0xa6   :  { %v201_v2 = vmax.f32 %v195_v57, 0.0  ;;  %958 = vmatpush.bf16.msrb.mxu0 %v1160_v53  ;;  %v1099_v53 = vld [vmem:[#allocation6 + $0x20] sm:$0xf]  ;;  %v1316_v57 = vor.u32 %v1528_v48, %v1315_v47 }
  0xa7   :  { %v1735_v4 = vpack.c.bf16 %v200_v63, %v200_v63  ;;  %971 = vmatpush.bf16.msrb.mxu1 %v1256_v59  ;;  %v1303_v59 = vld [vmem:[#allocation6 + $0x1b8] sm:$0xf]  ;;  %v1100_v61 = vor.u32 %v1474_v54, %v1099_v53  ;;  %v83_v54 = vld [vmem:[#allocation7 + $0x2] ss:$8 sm:$0x7] }
  0xa8   :  { %v1737_v10 = vpack.c.bf16 %v201_v2, %v201_v2  ;;  %v1399_v63 = vld [vmem:[#allocation6 + $0x278] sm:$0xf]  ;;  %v1471_v2 = vld [vmem:[#allocation6 + $0x10] sm:$0xf0]  ;;  %v1014_v56 = vperm.slane %v83_v54, 1 }
  0xa9   :  { %887 = vmatmul.bf16.vlgmr.msrb.gmra.mxu2 %v1735_v4  ;;  %v1400_v7 = vor.u32 %v1549_v0, %v1399_v63 }
  0xaa   :  { %900 = vmatmul.bf16.vlgmr.msrb.gmra.mxu3 %v1737_v10  ;;  %v183_v17 = vpop.f32.mrf.mxu2  ;;  %983 = vmatpush.bf16.msrb.mxu2 %v1364_v3  ;;  %v1183_v3 = vld [vmem:[#allocation6 + $0xc8] sm:$0xf] }
  0xab   :  { %v196_v19 = vpop.f32.mrf.mxu3  ;;  %996 = vmatpush.bf16.msrb.mxu3 %v1460_v5  ;;  %959 = vmatpush.bf16.msrb.mxu0 %v1148_v6  ;;  %v1495_v5 = vld [vmem:[#allocation6 + $0xd0] sm:$0xf0]  ;;  %v1304_v6 = vor.u32 %v1525_v60, %v1303_v59  ;;  %v1279_v17 = vld [vmem:[#allocation6 + $0x188] sm:$0xf]  ;;  %v1013_v60 = vperm.slane %v83_v54, 0 }
  0xac   :  { %972 = vmatpush.bf16.msrb.mxu1 %v1244_v11  ;;  %v1088_v11 = vor.u32 %v1471_v2, %v1087_v1  ;;  %v1184_v12 = vor.u32 %v1495_v5, %v1183_v3  ;;  %v1375_v19 = vld [vmem:[#allocation6 + $0x248] sm:$0xf]  ;;  %v1015_v1 = vperm.slane %v83_v54, 2 }
  0xae   :  { %984 = vmatpush.bf16.msrb.mxu2 %v1352_v18  ;;  %v1519_v18 = vld [vmem:[#allocation6 + $0x190] sm:$0xf0] }
  0xaf   :  { %997 = vmatpush.bf16.msrb.mxu3 %v1448_v20  ;;  %960 = vmatpush.bf16.msrb.mxu0 %v1136_v21  ;;  %v1543_v20 = vld [vmem:[#allocation6 + $0x250] sm:$0xf0]  ;;  %v1280_v21 = vor.u32 %v1519_v18, %v1279_v17 }
  0xb0   :  { %973 = vmatpush.bf16.msrb.mxu1 %v1232_v24  ;;  %v1376_v22 = vor.u32 %v1543_v20, %v1375_v19 }
  0xb1   :  { %913 = vmatmul.bf16.vlgmr.msra.gmra.mxu0 %v1729_v41 }
  0xb2   :  { %985 = vmatpush.bf16.msrb.mxu2 %v1340_v31  ;;  %926 = vmatmul.bf16.vlgmr.msra.gmra.mxu1 %v1731_v46 }
  0xb3   :  { %998 = vmatpush.bf16.msrb.mxu3 %v1436_v32  ;;  %961 = vmatpush.bf16.msrb.mxu0 %v1124_v35 }
  0xb4   :  { %974 = vmatpush.bf16.msrb.mxu1 %v1220_v36 }
  0xb6   :  { %986 = vmatpush.bf16.msrb.mxu2 %v1328_v44 }
  0xb7   :  { %999 = vmatpush.bf16.msrb.mxu3 %v1424_v45  ;;  %962 = vmatpush.bf16.msrb.mxu0 %v1112_v49 }
  0xb8   :  { %975 = vmatpush.bf16.msrb.mxu1 %v1208_v50 }
  0xb9   :  { %939 = vmatmul.bf16.vlgmr.msra.gmra.mxu2 %v1735_v4 }
  0xba   :  { %952 = vmatmul.bf16.vlgmr.msra.gmra.mxu3 %v1737_v10  ;;  %987 = vmatpush.bf16.msrb.mxu2 %v1316_v57 }
  0xbb   :  { %1000 = vmatpush.bf16.msrb.mxu3 %v1412_v58  ;;  %963 = vmatpush.bf16.msrb.mxu0 %v1100_v61 }
  0xbc   :  { %976 = vmatpush.bf16.msrb.mxu1 %v1196_v62 }
  0xbe   :  { %988 = vmatpush.bf16.msrb.mxu2 %v1304_v6 }
  0xbf   :  { %1001 = vmatpush.bf16.msrb.mxu3 %v1400_v7  ;;  %964 = vmatpush.bf16.msrb.mxu0 %v1088_v11  ;;  %v1687_v11 = vmov 0  }
  0xc0   :  { %977 = vmatpush.bf16.msrb.mxu1 %v1184_v12  ;;  %1574 = vset.pattern.permute.xlu0 %v1687_v11  ;;  %v84_v12 = vld [vmem:[#allocation7 + $0x3] ss:$0 sm:$0xff] }
  0xc2   :  { %989 = vmatpush.bf16.msrb.mxu2 %v1292_v15  ;;  %965 = vmatmul.bf16.vlgmr.msrb.gmra.mxu0 %v1729_v41  ;;  %v81_v41 = vld [vmem:[#allocation7 + $0x1] ss:$8 sm:$0x7] }
  0xc3   :  { %1002 = vmatpush.bf16.msrb.mxu3 %v1388_v16  ;;  %978 = vmatmul.bf16.vlgmr.msrb.gmra.mxu1 %v1731_v46  ;;  %v335_v46 = vperm.slane %v81_v41, 0  ;;  %v336_v35 = vperm.slane %v81_v41, 1  ;;  %v337_v44 = vperm.slane %v81_v41, 2 }
  0xc6   :  { %990 = vmatpush.bf16.msrb.mxu2 %v1280_v21 }
  0xc7   :  { %1003 = vmatpush.bf16.msrb.mxu3 %v1376_v22 }
  0xc9   :  { %991 = vmatmul.bf16.vlgmr.msrb.gmra.mxu2 %v1735_v4 }
  0xca   :  { %1004 = vmatmul.bf16.vlgmr.msrb.gmra.mxu3 %v1737_v10 }
 0x11e   :  { %v862_v23 = vpop.f32.mrf.mxu0 }
 0x11f   :  { %v875_v24 = vpop.f32.mrf.mxu1  ;;  %v863_v37 = vadd.f32 %v862_v23, %v335_v46 }
 0x121   :  { %v876_v39 = vadd.f32 %v875_v24, %v863_v37 }
 0x126   :  { %v864_v25 = vpop.f32.mrf.mxu0 }
 0x127   :  { %v877_v26 = vpop.f32.mrf.mxu1 }
 0x12c   :  { %v888_v27 = vpop.f32.mrf.mxu2 }
 0x12d   :  { %v901_v28 = vpop.f32.mrf.mxu3  ;;  %v889_v47 = vadd.f32 %v888_v27, %v876_v39 }
 0x12e   :  { %v914_v29 = vpop.f32.mrf.mxu0 }
 0x12f   :  { %v927_v30 = vpop.f32.mrf.mxu1  ;;  %v915_v4 = vadd.f32 %v914_v29, %v336_v35  ;;  %v902_v52 = vadd.f32 %v901_v28, %v889_v47 }
 0x131   :  { %v928_v40 = vadd.f32 %v927_v30, %v915_v4  ;;  %v1009_v59 = vmax.f32 %v902_v52, 0.0 }
 0x133   :  { %v1019_v2 = vmul.f32 %v1013_v60, %v1009_v59 }
 0x134   :  { %v890_v31 = vpop.f32.mrf.mxu2 }
 0x135   :  { %v903_v32 = vpop.f32.mrf.mxu3 }
 0x136   :  { %v916_v33 = vpop.f32.mrf.mxu0 }
 0x137   :  { %v929_v34 = vpop.f32.mrf.mxu1 }
 0x13c   :  { %v940_v36 = vpop.f32.mrf.mxu2 }
 0x13d   :  { %v953_v38 = vpop.f32.mrf.mxu3  ;;  %v941_v43 = vadd.f32 %v940_v36, %v928_v40 }
 0x13f   :  { %v966_v10 = vpop.f32.mrf.mxu0  ;;  %v954_v49 = vadd.f32 %v953_v38, %v941_v43 }
 0x140   :  { %v979_v42 = vpop.f32.mrf.mxu1  ;;  %v967_v50 = vadd.f32 %v966_v10, %v337_v44 }
 0x141   :  { %v1010_v55 = vmax.f32 %v954_v49, 0.0 }
 0x142   :  { %v980_v57 = vadd.f32 %v979_v42, %v967_v50 }
 0x143   :  { %v1020_v63 = vmul.f32 %v1014_v56, %v1010_v55 }
 0x144   :  { %v942_v45 = vpop.f32.mrf.mxu2 }
 0x145   :  { %v955_v48 = vpop.f32.mrf.mxu3  ;;  %v1022_v6 = vadd.f32 %v1020_v63, %v1019_v2 }
 0x147   :  { %v968_v51 = vpop.f32.mrf.mxu0 }
 0x148   :  { %v981_v53 = vpop.f32.mrf.mxu1 }
 0x14c   :  { %v992_v58 = vpop.f32.mrf.mxu2 }
 0x14d   :  { %v993_v61 = vadd.f32 %v992_v58, %v980_v57  ;;  %v1005_v62 = vpop.f32.mrf.mxu3 }
 0x14f   :  { %v1006_v0 = vadd.f32 %v1005_v62, %v993_v61 }
 0x151   :  { %v1011_v3 = vmax.f32 %v1006_v0, 0.0 }
 0x153   :  { %v1021_v5 = vmul.f32 %v1015_v1, %v1011_v3 }
 0x154   :  { %v994_v7 = vpop.f32.mrf.mxu2 }
 0x155   :  { %v1007_v8 = vpop.f32.mrf.mxu3  ;;  %v1023_v9 = vadd.f32 %v1022_v6, %v1021_v5 }
 0x157   :  { %1024 = vadd.xlane.f32.xlu0 %v1023_v9 }
 0x1ca   :  { %v1025_v13 = vpop.xlane.xlu0 %1024 }
 0x1cb   :  { %v1026_v14 = vadd.f32 %v1025_v13, %v84_v12 }
 0x1cd   :  { %1575 = vtanh.f32 %v1026_v14 }
 0x1d3   :  { %v1576_v15 = vpop.eup %1575 }
 0x1d4   :  { %1030 = vperm.xlu0 %1574, %v1576_v15  }
 0x246   :  { %v1031_v16 = vpop.permute.xlu0 %1030 }
 0x247   :  { %1033 = vst [vmem:[%s1756_s4] sm:$0xff] %v1031_v16 }
 0x248   :  { %1038 = vsyncpa [#allocation3], 1 }
 0x249   :  { %1039 = vsyncpa [#allocation5], 1 }
 0x24a   :  { %1040 = vsyncpa [#allocation8], 1 }

</bundles_post_ra>
